<compile_context>
chip_gen: v5e
topology: v5e:2x2
jax: 0.10.0
libtpu: 0.0.40
codegen_flags: <defaults>
</compile_context>

<pallas_src>
import jax
import jax.numpy as jnp
from jax.experimental import pallas as pl
from jax.experimental.pallas import tpu as pltpu


def neuralnet_board_kernel(
    x_ref,                      # (TILE_B, F)   concat([board, moves], -1) tile
    w1_ref, b1_ref,             # (F, H1), (1, H1)    fused linear_board + linear_moves
    w2_ref, b2_ref,             # (H1, H2), (1, H2)   linear_hidden
    wout_ref, bout_ref,         # (1, H2), (1, 1)     linear_output (weight stored as a lane row)
    out_ref,                    # (1, 1, TILE_B)      lane-dense logits
):
    x = x_ref[...]                                                        # (TILE_B, F)

    # ---- fused linear_board + linear_moves, ReLU ---------------------------------------------
    h1 = jnp.dot(x, w1_ref[...], preferred_element_type=jnp.float32) + b1_ref[...]
    h1 = jnp.maximum(h1, 0.0)                                             # dropout == identity

    # ---- linear_hidden, ReLU ------------------------------------------------------------------
    h2 = jnp.dot(h1, w2_ref[...], preferred_element_type=jnp.float32) + b2_ref[...]
    h2 = jnp.maximum(h2, 0.0)                                             # dropout == identity

    # ---- linear_output as a lane-dense (1, TILE_B) row ----------------------------------------
    # contract (1, H2) with (TILE_B, H2) on H2 -> (1, TILE_B); avoids a 1-column MXU matmul and
    # a 1-wide masked output store.
    logits = jax.lax.dot_general(
        wout_ref[...], h2,
        dimension_numbers=(((1,), (1,)), ((), ())),
        preferred_element_type=jnp.float32,
    ) + bout_ref[...]                                                     # (1, TILE_B)

    out_ref[...] = logits[None].astype(out_ref.dtype)                     # (1, 1, TILE_B)


def init_params(key, num_features_board, num_features_moves, hidden_units_1, hidden_units_2):
    """Synthetic parameters with the same shapes the PyTorch module creates, pre-transposed to
    (in, out). linear_board / linear_moves are fused into a single (Fb+Fm, H1) weight."""
    fb, fm, h1, h2 = num_features_board, num_features_moves, hidden_units_1, hidden_units_2
    ks = jax.random.split(key, 8)

    def w(k, shape, scale=0.05):
        return jax.random.normal(k, shape, dtype=jnp.float32) * scale

    wb = w(ks[0], (fb, h1)); bb = w(ks[1], (1, h1), 0.02)
    wm = w(ks[2], (fm, h1)); bm = w(ks[3], (1, h1), 0.02)

    return dict(
        w1=jnp.concatenate([wb, wm], axis=0),     # (fb + fm, h1): [board || moves] @ w1
        b1=bb + bm,                               # (1, h1)
        w2=w(ks[4], (h1, h2)),
        b2=w(ks[5], (1, h2), 0.02),
        wout=w(ks[6], (1, h2)),                   # head weight kept as a lane row
        bout=w(ks[7], (1, 1), 0.02),
    )


def neuralnet_board_forward(x, params, *, tile_b=128):
    """x = (board, sf_eval, moves); sf_eval is unused (matches the PyTorch forward)."""
    board, _sf_eval, moves = x
    b = board.shape[0]

    x_cat = jnp.concatenate(
        [board.reshape(b, -1), moves.reshape(b, -1)], axis=-1
    ).astype(jnp.float32)
    f = x_cat.shape[1]
    h1 = params["w1"].shape[1]
    h2 = params["w2"].shape[1]

    num_tiles = pl.cdiv(b, tile_b)
    b_pad = num_tiles * tile_b
    if b_pad != b:
        x_cat = jnp.pad(x_cat, ((0, b_pad - b), (0, 0)))

    const = lambda i: (0, 0)                      # weights: same block every step -> VMEM-resident
    grid_spec = pltpu.PrefetchScalarGridSpec(
        num_scalar_prefetch=0,
        grid=(num_tiles,),
        in_specs=[
            pl.BlockSpec((tile_b, f), lambda i: (i, 0)),   # activations streamed per batch tile
            pl.BlockSpec((f, h1), const),
            pl.BlockSpec((1, h1), const),
            pl.BlockSpec((h1, h2), const),
            pl.BlockSpec((1, h2), const),
            pl.BlockSpec((1, h2), const),
            pl.BlockSpec((1, 1), const),
        ],
        out_specs=pl.BlockSpec((1, 1, tile_b), lambda i: (i, 0, 0)),
    )

    cost = pl.CostEstimate(
        flops=int(2 * b_pad * (f * h1 + h1 * h2 + h2)),
        transcendentals=0,
        bytes_accessed=int(4 * (b_pad * f + f * h1 + h1 + h1 * h2 + h2 + h2 + 1 + b_pad)),
    )

    out = pl.pallas_call(
        neuralnet_board_kernel,
        out_shape=jax.ShapeDtypeStruct((num_tiles, 1, tile_b), jnp.float32),
        grid_spec=grid_spec,
        compiler_params=pltpu.CompilerParams(dimension_semantics=("parallel",)),
        cost_estimate=cost,
    )(x_cat, params["w1"], params["b1"], params["w2"], params["b2"],
      params["wout"], params["bout"])

    return out.reshape(b_pad)[:b]                  # (B,)  == .squeeze(dim=1)


def reference_forward(x, params):
    """Pure-JAX reference (same math as the PyTorch eval-mode forward)."""
    board, _sf_eval, moves = x
    b = board.shape[0]
    x_cat = jnp.concatenate([board.reshape(b, -1), moves.reshape(b, -1)], axis=-1)
    h1 = jnp.maximum(x_cat @ params["w1"] + params["b1"], 0.0)
    h2 = jnp.maximum(h1 @ params["w2"] + params["b2"], 0.0)
    return (h2 @ params["wout"].T + params["bout"]).reshape(b)


if __name__ == "__main__":
    NUM_FEATURES_BOARD = 128
    NUM_FEATURES_MOVES = 64
    HIDDEN_UNITS_1 = 128
    HIDDEN_UNITS_2 = 128
    BATCH = 16

    key = jax.random.PRNGKey(0)
    k_board, k_eval, k_moves, k_params = jax.random.split(key, 4)

    board = jax.random.normal(k_board, (BATCH, NUM_FEATURES_BOARD), dtype=jnp.float32)
    sf_eval = jax.random.normal(k_eval, (BATCH, 1), dtype=jnp.float32)   # unused by the forward
    moves = jax.random.normal(k_moves, (BATCH, NUM_FEATURES_MOVES), dtype=jnp.float32)

    params = init_params(k_params, NUM_FEATURES_BOARD, NUM_FEATURES_MOVES,
                         HIDDEN_UNITS_1, HIDDEN_UNITS_2)

    logits = neuralnet_board_forward((board, sf_eval, moves), params)
    jax.block_until_ready(logits)

    ref = reference_forward((board, sf_eval, moves), params)
    assert logits.shape == (BATCH,)
    assert bool(jnp.all(jnp.isfinite(logits)))
    max_err = float(jnp.max(jnp.abs(logits - ref)))
    assert max_err < 1e-2, f"mismatch vs reference, max abs err = {max_err}"
    print("KERNEL_OK")
</pallas_src>

<mosaic_0001>
module attributes {stable_mosaic.version = 11 : i64} {
  func.func @neuralnet_board_kernel(%arg0: i32, %arg1: memref<128x192xf32, #tpu.memory_space<vmem>>, %arg2: memref<192x128xf32, #tpu.memory_space<vmem>>, %arg3: memref<1x128xf32, #tpu.memory_space<vmem>>, %arg4: memref<128x128xf32, #tpu.memory_space<vmem>>, %arg5: memref<1x128xf32, #tpu.memory_space<vmem>>, %arg6: memref<1x128xf32, #tpu.memory_space<vmem>>, %arg7: memref<1x1xf32, #tpu.memory_space<vmem>>, %arg8: memref<1x1x128xf32, #tpu.memory_space<vmem>>) attributes {dimension_semantics = [#tpu.dimension_semantics<parallel>], iteration_bounds = array<i64: 1>, scalar_prefetch = 0 : i64, scratch_operands = 0 : i64, tpu.core_type = #tpu.core_type<tc>, window_params = [{transform_indices = @transform_0, window_bounds = array<i64: 128, 192>}, {pipeline_mode = #tpu.pipeline_mode<synchronous>, transform_indices = @transform_1, window_bounds = array<i64: 192, 128>}, {pipeline_mode = #tpu.pipeline_mode<synchronous>, transform_indices = @transform_2, window_bounds = array<i64: 1, 128>}, {pipeline_mode = #tpu.pipeline_mode<synchronous>, transform_indices = @transform_3, window_bounds = array<i64: 128, 128>}, {pipeline_mode = #tpu.pipeline_mode<synchronous>, transform_indices = @transform_4, window_bounds = array<i64: 1, 128>}, {pipeline_mode = #tpu.pipeline_mode<synchronous>, transform_indices = @transform_5, window_bounds = array<i64: 1, 128>}, {pipeline_mode = #tpu.pipeline_mode<synchronous>, transform_indices = @transform_6, window_bounds = array<i64: 1, 1>}, {transform_indices = @transform_7, window_bounds = array<i64: 1, 1, 128>}]} {
    %c0 = arith.constant 0 : index
    %c0_0 = arith.constant 0 : index
    %0 = vector.load %arg1[%c0, %c0_0] : memref<128x192xf32, #tpu.memory_space<vmem>>, vector<128x192xf32>
    %c0_1 = arith.constant 0 : index
    %c0_2 = arith.constant 0 : index
    %1 = vector.load %arg2[%c0_1, %c0_2] : memref<192x128xf32, #tpu.memory_space<vmem>>, vector<192x128xf32>
    %cst = arith.constant dense<0.000000e+00> : vector<128x128xf32>
    %2 = tpu.matmul %0, %1, %cst {dimension_numbers = #tpu.dot_dimension_numbers<[1], [0], [0], [1], [0, 0, 1, 1], [], []>} : vector<128x192xf32>, vector<192x128xf32>, vector<128x128xf32> -> vector<128x128xf32>
    %c0_3 = arith.constant 0 : index
    %c0_4 = arith.constant 0 : index
    %3 = vector.load %arg3[%c0_3, %c0_4] : memref<1x128xf32, #tpu.memory_space<vmem>>, vector<1x128xf32>
    %4 = vector.broadcast %3 : vector<1x128xf32> to vector<128x128xf32>
    %5 = arith.addf %2, %4 : vector<128x128xf32>
    %cst_5 = arith.constant 0.000000e+00 : f32
    %6 = vector.broadcast %cst_5 : f32 to vector<128x128xf32>
    %7 = arith.maximumf %5, %6 : vector<128x128xf32>
    %c0_6 = arith.constant 0 : index
    %c0_7 = arith.constant 0 : index
    %8 = vector.load %arg4[%c0_6, %c0_7] : memref<128x128xf32, #tpu.memory_space<vmem>>, vector<128x128xf32>
    %cst_8 = arith.constant dense<0.000000e+00> : vector<128x128xf32>
    %9 = tpu.matmul %7, %8, %cst_8 {dimension_numbers = #tpu.dot_dimension_numbers<[1], [0], [0], [1], [0, 0, 1, 1], [], []>} : vector<128x128xf32>, vector<128x128xf32>, vector<128x128xf32> -> vector<128x128xf32>
    %c0_9 = arith.constant 0 : index
    %c0_10 = arith.constant 0 : index
    %10 = vector.load %arg5[%c0_9, %c0_10] : memref<1x128xf32, #tpu.memory_space<vmem>>, vector<1x128xf32>
    %11 = vector.broadcast %10 : vector<1x128xf32> to vector<128x128xf32>
    %12 = arith.addf %9, %11 : vector<128x128xf32>
    %cst_11 = arith.constant 0.000000e+00 : f32
    %13 = vector.broadcast %cst_11 : f32 to vector<128x128xf32>
    %14 = arith.maximumf %12, %13 : vector<128x128xf32>
    %c0_12 = arith.constant 0 : index
    %c0_13 = arith.constant 0 : index
    %15 = vector.load %arg6[%c0_12, %c0_13] : memref<1x128xf32, #tpu.memory_space<vmem>>, vector<1x128xf32>
    %cst_14 = arith.constant dense<0.000000e+00> : vector<1x128xf32>
    %16 = tpu.matmul %15, %14, %cst_14 {dimension_numbers = #tpu.dot_dimension_numbers<[1], [1], [0], [0], [0, 0, 1, 0], [], []>} : vector<1x128xf32>, vector<128x128xf32>, vector<1x128xf32> -> vector<1x128xf32>
    %c0_15 = arith.constant 0 : index
    %c0_16 = arith.constant 0 : index
    %17 = vector.load %arg7[%c0_15, %c0_16] : memref<1x1xf32, #tpu.memory_space<vmem>>, vector<1x1xf32>
    %18 = vector.broadcast %17 : vector<1x1xf32> to vector<1x128xf32>
    %19 = arith.addf %16, %18 : vector<1x128xf32>
    %20 = vector.shape_cast %19 : vector<1x128xf32> to vector<1x1x128xf32>
    %c0_17 = arith.constant 0 : index
    %c0_18 = arith.constant 0 : index
    %c0_19 = arith.constant 0 : index
    %21 = vector.load %arg8[%c0_17, %c0_18, %c0_19] : memref<1x1x128xf32, #tpu.memory_space<vmem>>, vector<1x1x128xf32>
    tpu.vector_store %arg8[%c0_17, %c0_18, %c0_19], %20 {strides = array<i32>} : memref<1x1x128xf32, #tpu.memory_space<vmem>>, vector<1x1x128xf32>,
    return
  }
  func.func @transform_0(%arg0: i32) -> (i32, i32) {
    %c0_i32 = arith.constant 0 : i32
    %c0_i32_0 = arith.constant 0 : i32
    return %arg0, %c0_i32 : i32, i32
  }
  func.func @transform_1(%arg0: i32) -> (i32, i32) {
    %c0_i32 = arith.constant 0 : i32
    %c0_i32_0 = arith.constant 0 : i32
    %c0_i32_1 = arith.constant 0 : i32
    return %c0_i32, %c0_i32_0 : i32, i32
  }
  func.func @transform_2(%arg0: i32) -> (i32, i32) {
    %c0_i32 = arith.constant 0 : i32
    %c0_i32_0 = arith.constant 0 : i32
    %c0_i32_1 = arith.constant 0 : i32
    return %c0_i32, %c0_i32_0 : i32, i32
  }
  func.func @transform_3(%arg0: i32) -> (i32, i32) {
    %c0_i32 = arith.constant 0 : i32
    %c0_i32_0 = arith.constant 0 : i32
    %c0_i32_1 = arith.constant 0 : i32
    return %c0_i32, %c0_i32_0 : i32, i32
  }
  func.func @transform_4(%arg0: i32) -> (i32, i32) {
    %c0_i32 = arith.constant 0 : i32
    %c0_i32_0 = arith.constant 0 : i32
    %c0_i32_1 = arith.constant 0 : i32
    return %c0_i32, %c0_i32_0 : i32, i32
  }
  func.func @transform_5(%arg0: i32) -> (i32, i32) {
    %c0_i32 = arith.constant 0 : i32
    %c0_i32_0 = arith.constant 0 : i32
    %c0_i32_1 = arith.constant 0 : i32
    return %c0_i32, %c0_i32_0 : i32, i32
  }
  func.func @transform_6(%arg0: i32) -> (i32, i32) {
    %c0_i32 = arith.constant 0 : i32
    %c0_i32_0 = arith.constant 0 : i32
    %c0_i32_1 = arith.constant 0 : i32
    return %c0_i32, %c0_i32_0 : i32, i32
  }
  func.func @transform_7(%arg0: i32) -> (i32, i32, i32) {
    %c0_i32 = arith.constant 0 : i32
    %c0_i32_0 = arith.constant 0 : i32
    %c0_i32_1 = arith.constant 0 : i32
    return %arg0, %c0_i32, %c0_i32_0 : i32, i32, i32
  }
}

</mosaic_0001>

<bundles_post_ra>
// kernel: tpu_custom_call.1
= control target key start
LH: loop header
LB: loop body
LE: loop exit
PB: predicated region body
PF: predicated region fallthrough
CT: control target
= control target key end

     0   :  { %s787_s0 = inlined_call_operand.vmem [shape: f32[128,192], index: 0, kind: input, shape index: {}]   ;;  %s788_s1 = inlined_call_operand.vmem [shape: f32[192,128], index: 1, kind: input, shape index: {}]   ;;  %s789_s2 = inlined_call_operand.vmem [shape: f32[1,128], index: 2, kind: input, shape index: {}]   ;;  %s790_s3 = inlined_call_operand.vmem [shape: f32[128,128], index: 3, kind: input, shape index: {}]   ;;  %s791_s4 = inlined_call_operand.vmem [shape: f32[1,128], index: 4, kind: input, shape index: {}]   ;;  %s792_s5 = inlined_call_operand.vmem [shape: f32[1,128], index: 5, kind: input, shape index: {}]   ;;  %s793_s6 = inlined_call_operand.<no memory space> [shape: f32[1,1], index: 6, kind: input, shape index: {}]   ;;  %s794_s7 = inlined_call_operand.hbm [shape: f32[1,1,128], index: 7, kind: output, shape index: {}]  }
   0x1   :  { %v12_v0 = vstv %s793_s6 }
   0x2   :  { %13 = vst [vmem:[#allocation2] sm:$0x1] %v12_v0 }
   0x3   :  { %v76_v1 = vld [vmem:[%s788_s1 + $0x78] sm:$0xff]  ;;  %v75_v2 = vld [vmem:[%s788_s1 + $0x70] sm:$0xff]  ;;  %v74_v3 = vld [vmem:[%s788_s1 + $0x68] sm:$0xff] }
   0x4   :  { %138 = vmatpush.msra.mxu0 %v76_v1  ;;  %v84_v4 = vld [vmem:[%s788_s1 + $0xb8] sm:$0xff]  ;;  %v73_v5 = vld [vmem:[%s788_s1 + $0x60] sm:$0xff]  ;;  %v83_v6 = vld [vmem:[%s788_s1 + $0xb0] sm:$0xff] }
   0x5   :  { %211 = vmatpush.msra.mxu1 %v84_v4  ;;  %v82_v7 = vld [vmem:[%s788_s1 + $0xa8] sm:$0xff]  ;;  %v72_v8 = vld [vmem:[%s788_s1 + $0x58] sm:$0xff]  ;;  %v81_v9 = vld [vmem:[%s788_s1 + $0xa0] sm:$0xff] }
   0x6   :  { %139 = vmatpush.msra.mxu0 %v75_v2  ;;  %v71_v10 = vld [vmem:[%s788_s1 + $0x50] sm:$0xff]  ;;  %v80_v11 = vld [vmem:[%s788_s1 + $0x98] sm:$0xff]  ;;  %v70_v12 = vld [vmem:[%s788_s1 + $0x48] sm:$0xff] }
   0x7   :  { %212 = vmatpush.msra.mxu1 %v83_v6 }
   0x8   :  { %140 = vmatpush.msra.mxu0 %v74_v3 }
   0x9   :  { %213 = vmatpush.msra.mxu1 %v82_v7 }
   0xa   :  { %141 = vmatpush.msra.mxu0 %v73_v5 }
   0xb   :  { %214 = vmatpush.msra.mxu1 %v81_v9 }
   0xc   :  { %142 = vmatpush.msra.mxu0 %v72_v8 }
   0xd   :  { %14 = vsyncpa [#allocation4], 0  ;;  %v79_v13 = vld [vmem:[%s788_s1 + $0x90] sm:$0xff]  ;;  %v69_v14 = vld [vmem:[%s788_s1 + $0x40] sm:$0xff]  ;;  %215 = vmatpush.msra.mxu1 %v80_v11  ;;  %vm89_vm0 = vcmask 523264   ;;  %s478_s24 = smov [#allocation3]  }
   0xe   :  { %143 = vmatpush.msra.mxu0 %v71_v10  ;;  %v78_v15 = vld [vmem:[%s788_s1 + $0x88] sm:$0xff]  ;;  %v68_v16 = vld [vmem:[%s788_s1 + $0x38] sm:$0xff]  ;;  %v77_v17 = vld [vmem:[%s788_s1 + $0x80] sm:$0xff]  ;;  %s419_s25 = sshll.u32 %s478_s24, 4  ;;  %s421_s28 = sshll.u32 %s794_s7, 4  ;;  %s420_s25 = int_to_ptr.vmem [resolvable:$true] %s419_s25  ;;  %s422_s28 = int_to_ptr.hbm [resolvable:$true] %s421_s28 }
   0xf   :  { %216 = vmatpush.msra.mxu1 %v79_v13  ;;  %v67_v18 = vld [vmem:[%s788_s1 + $0x30] sm:$0xff]  ;;  %v30_v19 = vld [vmem:[%s787_s0 + $0x8] sm:$0xff]  ;;  %v65_v21 = vld [vmem:[%s788_s1 + $0x20] sm:$0xff] }
  0x10   :  { %144 = vmatpush.msra.mxu0 %v70_v12  ;;  %v66_v20 = vld [vmem:[%s788_s1 + $0x28] sm:$0xff]  ;;  %v64_v22 = vld [vmem:[%s788_s1 + $0x18] sm:$0xff]  ;;  %v63_v23 = vld [vmem:[%s788_s1 + $0x10] sm:$0xff] }
  0x11   :  { %217 = vmatpush.msra.mxu1 %v78_v15  ;;  %v32_v24 = vld [vmem:[%s787_s0 + $0x18] sm:$0xff]  ;;  %v62_v25 = vld [vmem:[%s788_s1 + $0x8] sm:$0xff]  ;;  %v61_v26 = vld [vmem:[%s788_s1] sm:$0xff] }
  0x12   :  { %145 = vmatpush.msra.mxu0 %v69_v14  ;;  %v29_v27 = vld [vmem:[%s787_s0] sm:$0xff]  ;;  %v34_v28 = vld [vmem:[%s787_s0 + $0x28] sm:$0xff]  ;;  %v31_v29 = vld [vmem:[%s787_s0 + $0x10] sm:$0xff] }
  0x13   :  { %218 = vmatpush.msra.mxu1 %v77_v17  ;;  %v36_v30 = vld [vmem:[%s787_s0 + $0x38] sm:$0xff]  ;;  %v33_v31 = vld [vmem:[%s787_s0 + $0x20] sm:$0xff]  ;;  %v38_v32 = vld [vmem:[%s787_s0 + $0x48] sm:$0xff] }
  0x14   :  { %146 = vmatpush.msra.mxu0 %v68_v16  ;;  %430 = vmatmul.msk.f32.vlgmr.msra.gmra.mxu1 %vm89_vm0, %v30_v19  ;;  %v35_v33 = vld [vmem:[%s787_s0 + $0x30] sm:$0xff]  ;;  %v40_v34 = vld [vmem:[%s787_s0 + $0x58] sm:$0xff]  ;;  %v37_v35 = vld [vmem:[%s787_s0 + $0x40] sm:$0xff] }
  0x15   :  { %v42_v36 = vld [vmem:[%s787_s0 + $0x68] sm:$0xff]  ;;  %v39_v37 = vld [vmem:[%s787_s0 + $0x50] sm:$0xff]  ;;  %v44_v38 = vld [vmem:[%s787_s0 + $0x78] sm:$0xff] }
  0x16   :  { %147 = vmatpush.msra.mxu0 %v67_v18  ;;  %v41_v39 = vld [vmem:[%s787_s0 + $0x60] sm:$0xff]  ;;  %v46_v40 = vld [vmem:[%s787_s0 + $0x88] sm:$0xff]  ;;  %v43_v41 = vld [vmem:[%s787_s0 + $0x70] sm:$0xff] }
  0x17   :  { %v48_v42 = vld [vmem:[%s787_s0 + $0x98] sm:$0xff]  ;;  %v45_v43 = vld [vmem:[%s787_s0 + $0x80] sm:$0xff]  ;;  %v50_v44 = vld [vmem:[%s787_s0 + $0xa8] sm:$0xff] }
  0x18   :  { %148 = vmatpush.msra.mxu0 %v66_v20  ;;  %v299_v45 = vld [vmem:[%s790_s3 + $0x78] sm:$0xff]  ;;  %v298_v46 = vld [vmem:[%s790_s3 + $0x70] sm:$0xff]  ;;  %v297_v49 = vld [vmem:[%s790_s3 + $0x68] sm:$0xff] }
  0x19   :  { %304 = vmatpush.msra.mxu2 %v299_v45  ;;  %v47_v47 = vld [vmem:[%s787_s0 + $0x90] sm:$0xff]  ;;  %v52_v48 = vld [vmem:[%s787_s0 + $0xb8] sm:$0xff]  ;;  %v296_v50 = vld [vmem:[%s790_s3 + $0x60] sm:$0xff] }
  0x1a   :  { %149 = vmatpush.msra.mxu0 %v65_v21  ;;  %v295_v51 = vld [vmem:[%s790_s3 + $0x58] sm:$0xff]  ;;  %v294_v52 = vld [vmem:[%s790_s3 + $0x50] sm:$0xff]  ;;  %v49_v53 = vld [vmem:[%s787_s0 + $0xa0] sm:$0xff] }
  0x1b   :  { %305 = vmatpush.msra.mxu2 %v298_v46  ;;  %v54_v54 = vld [vmem:[%s787_s0 + $0xc8] sm:$0xff]  ;;  %v292_v56 = vld [vmem:[%s790_s3 + $0x40] sm:$0xff]  ;;  %v291_v57 = vld [vmem:[%s790_s3 + $0x38] sm:$0xff] }
  0x1c   :  { %150 = vmatpush.msra.mxu0 %v64_v22  ;;  %431 = vmatmul.msk.f32.gmra.mxu1 %vm89_vm0, %v32_v24  ;;  %v293_v55 = vld [vmem:[%s790_s3 + $0x48] sm:$0xff]  ;;  %v290_v58 = vld [vmem:[%s790_s3 + $0x30] sm:$0xff]  ;;  %v56_v60 = vld [vmem:[%s787_s0 + $0xd8] sm:$0xff] }
  0x1d   :  { %306 = vmatpush.msra.mxu2 %v297_v49  ;;  %v51_v59 = vld [vmem:[%s787_s0 + $0xb0] sm:$0xff]  ;;  %v289_v61 = vld [vmem:[%s790_s3 + $0x28] sm:$0xff]  ;;  %v288_v62 = vld [vmem:[%s790_s3 + $0x20] sm:$0xff] }
  0x1e   :  { %151 = vmatpush.msra.mxu0 %v63_v23  ;;  %v287_v63 = vld [vmem:[%s790_s3 + $0x18] sm:$0xff]  ;;  %v53_v0 = vld [vmem:[%s787_s0 + $0xc0] sm:$0xff]  ;;  %v286_v1 = vld [vmem:[%s790_s3 + $0x10] sm:$0xff] }
  0x1f   :  { %307 = vmatpush.msra.mxu2 %v296_v50  ;;  %v58_v2 = vld [vmem:[%s787_s0 + $0xe8] sm:$0xff]  ;;  %v284_v4 = vld [vmem:[%s790_s3] sm:$0xff]  ;;  %v55_v5 = vld [vmem:[%s787_s0 + $0xd0] sm:$0xff] }
  0x20   :  { %152 = vmatpush.msra.mxu0 %v62_v25  ;;  %v285_v3 = vld [vmem:[%s790_s3 + $0x8] sm:$0xff]  ;;  %v60_v6 = vld [vmem:[%s787_s0 + $0xf8] sm:$0xff]  ;;  %v57_v7 = vld [vmem:[%s787_s0 + $0xe0] sm:$0xff] }
  0x21   :  { %308 = vmatpush.msra.mxu2 %v295_v51  ;;  %v59_v9 = vld [vmem:[%s787_s0 + $0xf0] sm:$0xff]  ;;  %v757_v11 = vld [vmem:[%s789_s2] ss:$0 sm:$0xff] }
  0x22   :  { %153 = vmatpush.msra.mxu0 %v61_v26 }
  0x23   :  { %154 = vmatmul.f32.vlgmr.msra.gmra.mxu0 %v29_v27  ;;  %309 = vmatpush.msra.mxu2 %v294_v52 }
  0x24   :  { %432 = vmatmul.msk.f32.gmra.mxu1 %vm89_vm0, %v34_v28 }
  0x25   :  { %310 = vmatpush.msra.mxu2 %v293_v55 }
  0x27   :  { %311 = vmatpush.msra.mxu2 %v292_v56 }
  0x29   :  { %312 = vmatpush.msra.mxu2 %v291_v57 }
  0x2b   :  { %157 = vmatmul.f32.gmra.mxu0 %v31_v29  ;;  %313 = vmatpush.msra.mxu2 %v290_v58 }
  0x2c   :  { %433 = vmatmul.msk.f32.gmra.mxu1 %vm89_vm0, %v36_v30 }
  0x2d   :  { %314 = vmatpush.msra.mxu2 %v289_v61 }
  0x2f   :  { %315 = vmatpush.msra.mxu2 %v288_v62 }
  0x31   :  { %316 = vmatpush.msra.mxu2 %v287_v63 }
  0x33   :  { %160 = vmatmul.f32.gmra.mxu0 %v33_v31  ;;  %317 = vmatpush.msra.mxu2 %v286_v1 }
  0x34   :  { %434 = vmatmul.msk.f32.gmra.mxu1 %vm89_vm0, %v38_v32 }
  0x35   :  { %318 = vmatpush.msra.mxu2 %v285_v3 }
  0x37   :  { %319 = vmatpush.msra.mxu2 %v284_v4 }
  0x3b   :  { %163 = vmatmul.f32.gmra.mxu0 %v35_v33 }
  0x3c   :  { %435 = vmatmul.msk.f32.gmra.mxu1 %vm89_vm0, %v40_v34 }
  0x43   :  { %166 = vmatmul.f32.gmra.mxu0 %v37_v35 }
  0x44   :  { %436 = vmatmul.msk.f32.gmra.mxu1 %vm89_vm0, %v42_v36 }
  0x4b   :  { %169 = vmatmul.f32.gmra.mxu0 %v39_v37 }
  0x4c   :  { %437 = vmatmul.msk.f32.gmra.mxu1 %vm89_vm0, %v44_v38 }
  0x53   :  { %172 = vmatmul.f32.gmra.mxu0 %v41_v39 }
  0x54   :  { %438 = vmatmul.msk.f32.gmra.mxu1 %vm89_vm0, %v46_v40 }
  0x5b   :  { %175 = vmatmul.f32.gmra.mxu0 %v43_v41 }
  0x5c   :  { %439 = vmatmul.msk.f32.gmra.mxu1 %vm89_vm0, %v48_v42 }
  0x63   :  { %178 = vmatmul.f32.gmra.mxu0 %v45_v43 }
  0x64   :  { %440 = vmatmul.msk.f32.gmra.mxu1 %vm89_vm0, %v50_v44 }
  0x6b   :  { %181 = vmatmul.f32.gmra.mxu0 %v47_v47 }
  0x6c   :  { %441 = vmatmul.msk.f32.gmra.mxu1 %vm89_vm0, %v52_v48 }
  0x73   :  { %184 = vmatmul.f32.gmra.mxu0 %v49_v53 }
  0x74   :  { %442 = vmatmul.msk.f32.gmra.mxu1 %vm89_vm0, %v54_v54 }
  0x7b   :  { %187 = vmatmul.f32.gmra.mxu0 %v51_v59 }
  0x7c   :  { %443 = vmatmul.msk.f32.gmra.mxu1 %vm89_vm0, %v56_v60 }
  0x83   :  { %190 = vmatmul.f32.gmra.mxu0 %v53_v0 }
  0x84   :  { %444 = vmatmul.msk.f32.gmra.mxu1 %vm89_vm0, %v58_v2 }
  0x8b   :  { %193 = vmatmul.f32.gmra.mxu0 %v55_v5 }
  0x8c   :  { %445 = vmatmul.msk.f32.gmra.mxu1 %vm89_vm0, %v60_v6 }
  0x91   :  { %v220_v8 = vpop.f32.mrf.mxu1 }
  0x93   :  { %196 = vmatmul.f32.gmra.mxu0 %v57_v7 }
  0x99   :  { %v223_v10 = vpop.f32.mrf.mxu1 }
  0x9b   :  { %199 = vmatmul.f32.gmra.mxu0 %v59_v9 }
  0xa0   :  { %v155_v12 = vpop.f32.mrf.mxu0 }
  0xa1   :  { %v156_v13 = vadd.f32 %v757_v11, %v155_v12  ;;  %v226_v15 = vpop.f32.mrf.mxu1 }
  0xa3   :  { %v221_v14 = vadd.f32 %v220_v8, %v156_v13 }
  0xa5   :  { %v268_v16 = vmax.f32 %v221_v14, 0.0 }
  0xa7   :  { %320 = vmatmul.f32.vlgmr.msra.gmra.mxu2 %v268_v16 }
  0xa8   :  { %v158_v17 = vpop.f32.mrf.mxu0 }
  0xa9   :  { %v159_v18 = vadd.f32 %v757_v11, %v158_v17  ;;  %v229_v20 = vpop.f32.mrf.mxu1 }
  0xab   :  { %v224_v19 = vadd.f32 %v223_v10, %v159_v18 }
  0xad   :  { %v269_v21 = vmax.f32 %v224_v19, 0.0 }
  0xaf   :  { %323 = vmatmul.f32.gmra.mxu2 %v269_v21 }
  0xb0   :  { %v161_v22 = vpop.f32.mrf.mxu0 }
  0xb1   :  { %v162_v23 = vadd.f32 %v757_v11, %v161_v22  ;;  %v232_v25 = vpop.f32.mrf.mxu1 }
  0xb3   :  { %v227_v24 = vadd.f32 %v226_v15, %v162_v23 }
  0xb5   :  { %v270_v26 = vmax.f32 %v227_v24, 0.0 }
  0xb7   :  { %326 = vmatmul.f32.gmra.mxu2 %v270_v26 }
  0xb8   :  { %v164_v27 = vpop.f32.mrf.mxu0 }
  0xb9   :  { %v165_v28 = vadd.f32 %v757_v11, %v164_v27  ;;  %v235_v30 = vpop.f32.mrf.mxu1 }
  0xbb   :  { %v230_v29 = vadd.f32 %v229_v20, %v165_v28 }
  0xbd   :  { %v271_v31 = vmax.f32 %v230_v29, 0.0 }
  0xbf   :  { %329 = vmatmul.f32.gmra.mxu2 %v271_v31 }
  0xc0   :  { %v167_v32 = vpop.f32.mrf.mxu0 }
  0xc1   :  { %v168_v33 = vadd.f32 %v757_v11, %v167_v32  ;;  %v238_v35 = vpop.f32.mrf.mxu1 }
  0xc3   :  { %v233_v34 = vadd.f32 %v232_v25, %v168_v33 }
  0xc5   :  { %v272_v36 = vmax.f32 %v233_v34, 0.0 }
  0xc7   :  { %332 = vmatmul.f32.gmra.mxu2 %v272_v36 }
  0xc8   :  { %v170_v37 = vpop.f32.mrf.mxu0 }
  0xc9   :  { %v171_v38 = vadd.f32 %v757_v11, %v170_v37  ;;  %v241_v40 = vpop.f32.mrf.mxu1 }
  0xcb   :  { %v236_v39 = vadd.f32 %v235_v30, %v171_v38 }
  0xcd   :  { %v273_v41 = vmax.f32 %v236_v39, 0.0 }
  0xcf   :  { %335 = vmatmul.f32.gmra.mxu2 %v273_v41 }
  0xd0   :  { %v173_v42 = vpop.f32.mrf.mxu0 }
  0xd1   :  { %v174_v43 = vadd.f32 %v757_v11, %v173_v42  ;;  %v244_v45 = vpop.f32.mrf.mxu1 }
  0xd3   :  { %v239_v44 = vadd.f32 %v238_v35, %v174_v43 }
  0xd5   :  { %v274_v46 = vmax.f32 %v239_v44, 0.0 }
  0xd7   :  { %338 = vmatmul.f32.gmra.mxu2 %v274_v46 }
  0xd8   :  { %v176_v47 = vpop.f32.mrf.mxu0 }
  0xd9   :  { %v177_v48 = vadd.f32 %v757_v11, %v176_v47  ;;  %v247_v50 = vpop.f32.mrf.mxu1 }
  0xdb   :  { %v242_v49 = vadd.f32 %v241_v40, %v177_v48 }
  0xdd   :  { %v275_v51 = vmax.f32 %v242_v49, 0.0 }
  0xdf   :  { %341 = vmatmul.f32.gmra.mxu2 %v275_v51 }
  0xe0   :  { %v179_v52 = vpop.f32.mrf.mxu0 }
  0xe1   :  { %v180_v53 = vadd.f32 %v757_v11, %v179_v52  ;;  %v250_v56 = vpop.f32.mrf.mxu1 }
  0xe3   :  { %v245_v54 = vadd.f32 %v244_v45, %v180_v53 }
  0xe5   :  { %v276_v55 = vmax.f32 %v245_v54, 0.0 }
  0xe7   :  { %344 = vmatmul.f32.gmra.mxu2 %v276_v55 }
  0xe8   :  { %v182_v57 = vpop.f32.mrf.mxu0 }
  0xe9   :  { %v183_v58 = vadd.f32 %v757_v11, %v182_v57  ;;  %v253_v62 = vpop.f32.mrf.mxu1 }
  0xeb   :  { %v248_v59 = vadd.f32 %v247_v50, %v183_v58 }
  0xed   :  { %v277_v60 = vmax.f32 %v248_v59, 0.0 }
  0xef   :  { %347 = vmatmul.f32.gmra.mxu2 %v277_v60 }
  0xf0   :  { %v185_v61 = vpop.f32.mrf.mxu0 }
  0xf1   :  { %v186_v63 = vadd.f32 %v757_v11, %v185_v61  ;;  %v256_v4 = vpop.f32.mrf.mxu1 }
  0xf3   :  { %v251_v0 = vadd.f32 %v250_v56, %v186_v63  ;;  %v477_v63 = vmov 0  }
  0xf4   :  { %448 = vset.pattern.permute.xlu0 %v477_v63 }
  0xf5   :  { %v278_v1 = vmax.f32 %v251_v0, 0.0 }
  0xf7   :  { %350 = vmatmul.f32.gmra.mxu2 %v278_v1 }
  0xf8   :  { %v188_v2 = vpop.f32.mrf.mxu0 }
  0xf9   :  { %v189_v3 = vadd.f32 %v757_v11, %v188_v2  ;;  %v259_v10 = vpop.f32.mrf.mxu1 }
  0xfb   :  { %v254_v5 = vadd.f32 %v253_v62, %v189_v3  ;;  %v386_v62 = vld [vmem:[#allocation2] sm:$0x1] }
  0xfc   :  { %389 = vperm.xlu0 %448, %v386_v62  }
  0xfd   :  { %v279_v6 = vmax.f32 %v254_v5, 0.0 }
  0xff   :  { %353 = vmatmul.f32.gmra.mxu2 %v279_v6 }
 0x100   :  { %v191_v7 = vpop.f32.mrf.mxu0 }
 0x101   :  { %v192_v8 = vadd.f32 %v757_v11, %v191_v7  ;;  %v262_v17 = vpop.f32.mrf.mxu1 }
 0x103   :  { %v257_v9 = vadd.f32 %v256_v4, %v192_v8 }
 0x105   :  { %v280_v12 = vmax.f32 %v257_v9, 0.0 }
 0x107   :  { %356 = vmatmul.f32.gmra.mxu2 %v280_v12 }
 0x108   :  { %v194_v13 = vpop.f32.mrf.mxu0 }
 0x109   :  { %v195_v14 = vadd.f32 %v757_v11, %v194_v13  ;;  %v265_v23 = vpop.f32.mrf.mxu1 }
 0x10b   :  { %v260_v15 = vadd.f32 %v259_v10, %v195_v14  ;;  %v385_v14 = vld [vmem:[%s792_s5] sm:$0x1] }
 0x10d   :  { %v281_v16 = vmax.f32 %v260_v15, 0.0 }
 0x10f   :  { %359 = vmatmul.f32.gmra.mxu2 %v281_v16 }
 0x110   :  { %v197_v18 = vpop.f32.mrf.mxu0 }
 0x111   :  { %v198_v19 = vadd.f32 %v757_v11, %v197_v18 }
 0x113   :  { %v263_v20 = vadd.f32 %v262_v17, %v198_v19 }
 0x115   :  { %v282_v21 = vmax.f32 %v263_v20, 0.0 }
 0x117   :  { %362 = vmatmul.f32.gmra.mxu2 %v282_v21 }
 0x118   :  { %v200_v22 = vpop.f32.mrf.mxu0 }
 0x119   :  { %v201_v24 = vadd.f32 %v757_v11, %v200_v22  ;;  %v450_v11 = vld [vmem:[%s791_s4] ss:$0 sm:$0xff] }
 0x11b   :  { %v266_v25 = vadd.f32 %v265_v23, %v201_v24 }
 0x11d   :  { %v283_v26 = vmax.f32 %v266_v25, 0.0 }
 0x11f   :  { %365 = vmatmul.f32.gmra.mxu2 %v283_v26 }
 0x12a   :  { %v775_v27 = vpop.f32.mrf.mxu2 }
 0x12b   :  { %v322_v10 = vadd.f32 %v450_v11, %v775_v27 }
 0x12d   :  { %v369_v13 = vmax.f32 %v322_v10, 0.0 }
 0x132   :  { %v324_v28 = vpop.f32.mrf.mxu2 }
 0x133   :  { %v325_v8 = vadd.f32 %v450_v11, %v324_v28 }
 0x135   :  { %v370_v12 = vmax.f32 %v325_v8, 0.0 }
 0x13a   :  { %v327_v29 = vpop.f32.mrf.mxu2 }
 0x13b   :  { %v328_v6 = vadd.f32 %v450_v11, %v327_v29 }
 0x13d   :  { %v371_v9 = vmax.f32 %v328_v6, 0.0 }
 0x142   :  { %v330_v30 = vpop.f32.mrf.mxu2 }
 0x143   :  { %v331_v4 = vadd.f32 %v450_v11, %v330_v30 }
 0x145   :  { %v372_v7 = vmax.f32 %v331_v4, 0.0 }
 0x14a   :  { %v333_v31 = vpop.f32.mrf.mxu2 }
 0x14b   :  { %v334_v2 = vadd.f32 %v450_v11, %v333_v31 }
 0x14d   :  { %v373_v5 = vmax.f32 %v334_v2, 0.0 }
 0x152   :  { %v336_v32 = vpop.f32.mrf.mxu2 }
 0x153   :  { %v337_v0 = vadd.f32 %v450_v11, %v336_v32 }
 0x155   :  { %v374_v3 = vmax.f32 %v337_v0, 0.0 }
 0x15a   :  { %v339_v33 = vpop.f32.mrf.mxu2 }
 0x15b   :  { %v340_v60 = vadd.f32 %v450_v11, %v339_v33 }
 0x15d   :  { %v375_v1 = vmax.f32 %v340_v60, 0.0 }
 0x162   :  { %v342_v34 = vpop.f32.mrf.mxu2 }
 0x163   :  { %v343_v58 = vadd.f32 %v450_v11, %v342_v34 }
 0x165   :  { %v376_v61 = vmax.f32 %v343_v58, 0.0 }
 0x16a   :  { %v345_v35 = vpop.f32.mrf.mxu2 }
 0x16b   :  { %v346_v56 = vadd.f32 %v450_v11, %v345_v35 }
 0x16d   :  { %v377_v59 = vmax.f32 %v346_v56, 0.0 }
 0x16e   :  { %v390_v15 = vpop.permute.xlu0 %389 }
 0x16f   :  { %v392_v16 = vperm.slane %v390_v15, 0 }
 0x172   :  { %v348_v36 = vpop.f32.mrf.mxu2 }
 0x173   :  { %v349_v54 = vadd.f32 %v450_v11, %v348_v36 }
 0x175   :  { %v378_v57 = vmax.f32 %v349_v54, 0.0 }
 0x17a   :  { %v351_v37 = vpop.f32.mrf.mxu2 }
 0x17b   :  { %v352_v52 = vadd.f32 %v450_v11, %v351_v37 }
 0x17d   :  { %v379_v55 = vmax.f32 %v352_v52, 0.0 }
 0x182   :  { %v354_v38 = vpop.f32.mrf.mxu2 }
 0x183   :  { %v355_v50 = vadd.f32 %v450_v11, %v354_v38 }
 0x185   :  { %v380_v53 = vmax.f32 %v355_v50, 0.0 }
 0x18a   :  { %v357_v39 = vpop.f32.mrf.mxu2 }
 0x18b   :  { %v358_v48 = vadd.f32 %v450_v11, %v357_v39 }
 0x18d   :  { %v381_v51 = vmax.f32 %v358_v48, 0.0 }
 0x192   :  { %v360_v40 = vpop.f32.mrf.mxu2 }
 0x193   :  { %v361_v46 = vadd.f32 %v450_v11, %v360_v40 }
 0x195   :  { %v382_v49 = vmax.f32 %v361_v46, 0.0 }
 0x19a   :  { %v363_v41 = vpop.f32.mrf.mxu2 }
 0x19b   :  { %v364_v44 = vadd.f32 %v450_v11, %v363_v41 }
 0x19d   :  { %v383_v47 = vmax.f32 %v364_v44, 0.0 }
 0x1a2   :  { %v366_v42 = vpop.f32.mrf.mxu2 }
 0x1a3   :  { %v367_v43 = vadd.f32 %v450_v11, %v366_v42 }
 0x1a5   :  { %v384_v45 = vmax.f32 %v367_v43, 0.0 }
 0x1a7   :  { %393 = vmatpush.xpose.msra.mxu3 %v384_v45 }
 0x1ab   :  { %394 = vmatpush.xpose.msra.mxu3 %v383_v47 }
 0x1af   :  { %395 = vmatpush.xpose.msra.mxu3 %v382_v49 }
 0x1b3   :  { %396 = vmatpush.xpose.msra.mxu3 %v381_v51 }
 0x1b7   :  { %397 = vmatpush.xpose.msra.mxu3 %v380_v53 }
 0x1bb   :  { %398 = vmatpush.xpose.msra.mxu3 %v379_v55 }
 0x1bf   :  { %399 = vmatpush.xpose.msra.mxu3 %v378_v57 }
 0x1c3   :  { %400 = vmatpush.xpose.msra.mxu3 %v377_v59 }
 0x1c7   :  { %401 = vmatpush.xpose.msra.mxu3 %v376_v61 }
 0x1cb   :  { %402 = vmatpush.xpose.msra.mxu3 %v375_v1 }
 0x1cf   :  { %403 = vmatpush.xpose.msra.mxu3 %v374_v3 }
 0x1d3   :  { %404 = vmatpush.xpose.msra.mxu3 %v373_v5 }
 0x1d7   :  { %405 = vmatpush.xpose.msra.mxu3 %v372_v7 }
 0x1db   :  { %406 = vmatpush.xpose.msra.mxu3 %v371_v9 }
 0x1df   :  { %407 = vmatpush.xpose.msra.mxu3 %v370_v12 }
 0x1e3   :  { %408 = vmatpush.xpose.msra.mxu3 %v369_v13 }
 0x1e6   :  { %409 = vmatmul.f32.vlgmr.msra.gmra.mxu3 %v385_v14 }
 0x269   :  { %v410_v17 = vpop.f32.mrf.mxu3 }
 0x26a   :  { %v411_v18 = vadd.f32 %v410_v17, %v392_v16 }
 0x26c   :  { %413 = vst [vmem:[#allocation3] sm:$0x1] %v411_v18 }
 0x26d   :  { %424 = dma.vmem_to_hbm [thread:$0]  %s420_s25, 16, %s422_s28, [#allocation4]  }
 0x26e   :  { %475 = dma.done.wait [#allocation4], 16  }
 0x26f   :  { %476 = vsyncadd [#allocation4], 4294967280 }
 0x270   :  { %429 = vsyncpa [#allocation4], 1 }

</bundles_post_ra>
